<compile_context>
chip_gen: v7x
topology: tpu7x:2x2x1
jax: 0.10.0
libtpu: 0.0.40
codegen_flags: <defaults>
</compile_context>

<pallas_src>
import jax
import jax.numpy as jnp
from jax.experimental import pallas as pl
from jax.experimental.pallas import tpu as pltpu


_LANE = 128
_MAX_TILE_LANES = 8192   # 4-8 MiB slabs already reach ~85% of the HBM roofline
_BB_CAP = 32             # cap on the statically unrolled batch-block loop


def _ceil_div(a, b):
    return -(-a // b)


# ------------------------------------------------------------------ kernel bodies
def _kernel_expanded(w_ref, x_ref, o_ref):
    # w_ref: (C, C) weight with group rows pre-expanded (row c == group row of c).
    # x_ref/o_ref: (Bb, C, T).  The max is purely elementwise; the per-b loop is a
    # static unroll over the (small, capped) batch block.
    w = w_ref[...]
    for b in range(x_ref.shape[0]):
        x = x_ref[b]                                                   # (C, T), I/O dtype
        m = jnp.dot(w, x, preferred_element_type=jnp.float32)          # (C, T) f32, MXU
        # Max in the I/O dtype: avoids materializing a C*T f32 copy of x (VMEM and
        # vld/vst traffic); the only difference vs an f32 max is rounding m before
        # instead of after the compare.
        o_ref[b] = jnp.maximum(x, m.astype(x.dtype))


def _kernel_grouped_sliced(w_ref, x_ref, o_ref):
    # w_ref: (g, C) un-expanded weight (used for large C).  The per-group row count is
    # sublane-aligned (checked by the caller) so the static row slices are pure views
    # and the single m row sublane-broadcasts -- no reshape, no relayout copies.
    g, C = w_ref.shape
    per = C // g
    w = w_ref[...]
    for b in range(x_ref.shape[0]):
        x = x_ref[b]                                                   # (C, T)
        m = jnp.dot(w, x, preferred_element_type=jnp.float32)          # (g, T)
        m = m.astype(x.dtype)
        for j in range(g):                                             # static slices
            lo = j * per
            o_ref[b, lo:lo + per, :] = jnp.maximum(x[lo:lo + per, :], m[j:j + 1, :])


def _kernel_grouped_reshape(w_ref, x_ref, o_ref):
    # Fallback for group sizes that are not sublane-aligned: reshape/broadcast form.
    g, C = w_ref.shape
    per = C // g
    w = w_ref[...]
    for b in range(x_ref.shape[0]):
        x = x_ref[b]
        T = x.shape[-1]
        m = jnp.dot(w, x, preferred_element_type=jnp.float32).astype(x.dtype)  # (g, T)
        y = jnp.maximum(x.reshape(g, per, T), m[:, None, :])
        o_ref[b] = y.reshape(C, T)


# ------------------------------------------------------------------ parameter glue
def _effective_weight(weight, groups, C):
    """Builds the effective 1x1-conv weight (g, C) -- plain JAX parameter glue."""
    g = groups
    Wc = weight - weight.mean(axis=2, keepdims=True)                   # (g, g, C//g)
    Wg = Wc.reshape(g, C)                                              # (g, C)
    a = (g * jnp.arange(C)) // C                                       # group of in-channel
    b = jnp.arange(g)
    W0 = (a[None, :] == b[:, None]).astype(weight.dtype) * (g / C)
    return Wg + W0                                                     # (g, C)


# ------------------------------------------------------------------ pallas wrapper
def _run_kernel(x_flat, w_arr, kernel, HW):
    """x_flat: (Bf, C, HW); w_arr: (rows, C).  Returns (Bf, C, HW)."""
    Bf, C, _ = x_flat.shape
    itemsize = jnp.dtype(x_flat.dtype).itemsize
    w_rows = w_arr.shape[0]
    w_bytes = w_rows * C * itemsize

    # --- per-generation VMEM sizing -------------------------------------------
    # get_tpu_info() reports the per-core VMEM capacity; fall back to the v7x
    # per-TensorCore figure (64 MiB) if the query is unavailable.
    try:
        vmem_phys = int(pltpu.get_tpu_info().vmem_capacity_bytes)
    except Exception:
        vmem_phys = 64 * 1024 * 1024
    # Working-set budget: double-buffered x + out tiles, the f32 matmul result plus
    # compare temporaries (~3 * C * T * 4 bytes), and the resident weight.  Keep it
    # at <= ~45% of physical VMEM so vmem_limit (~0.72 * phys) still leaves headroom
    # for Mosaic's internal scratch on v7x's 64 MiB cores.
    budget = int(0.45 * vmem_phys)

    def step_bytes(tile_lanes, bb):
        return (4 * bb * C * tile_lanes * itemsize        # in + out, double-buffered
                + 3 * C * tile_lanes * 4                  # f32 matmul result + temps
                + w_bytes)

    # --- lane-dense spatial tiling (balanced across grid steps) ----------------
    hw_lanes = _ceil_div(HW, _LANE)
    hw_ceil = hw_lanes * _LANE
    t_raw = max(0, budget - w_bytes) // (C * (4 * itemsize + 12))
    tile = max(_LANE, min((t_raw // _LANE) * _LANE, _MAX_TILE_LANES, hw_ceil))
    # (If even a single 128-lane tile exceeds the budget -- enormous C -- we still run
    #  with tile=128 and let vmem_limit_bytes absorb it below.)
    grid_s = _ceil_div(hw_ceil, tile)
    tile = _ceil_div(hw_lanes, grid_s) * _LANE            # equalize tiles, min padding
    HW_pad = tile * grid_s

    # --- batch blocking for small images ---------------------------------------
    # If the whole (padded) image fits in one spatial tile, block over the batch so
    # each grid step still moves a large slab (otherwise the per-step grid overhead
    # dominates ~128 KiB DMAs).
    Bb = 1
    if grid_s == 1 and Bf > 1:
        bb_fit = max(1, (budget - 3 * C * tile * 4 - w_bytes)
                     // (4 * C * tile * itemsize))
        Bb = int(min(Bf, _BB_CAP, bb_fit))

    # --- guarantee >= 2 grid steps when the shape allows (v7x has 2 TCs) --------
    grid_b = _ceil_div(Bf, Bb)
    if grid_b * grid_s == 1:
        if Bb > 1:
            Bb = _ceil_div(Bb, 2)
            grid_b = _ceil_div(Bf, Bb)
        elif hw_lanes >= 2:
            grid_s = 2
            tile = _ceil_div(hw_lanes, 2) * _LANE
            HW_pad = tile * grid_s

    Bf_pad = grid_b * Bb
    pad_b = Bf_pad - Bf
    pad_s = HW_pad - HW
    if pad_b or pad_s:
        x_flat = jnp.pad(x_flat, ((0, pad_b), (0, 0), (0, pad_s)))

    need = step_bytes(tile, Bb)
    vmem_limit = int(min(vmem_phys, max(0.72 * vmem_phys, need + (2 << 20))))

    flops = 2 * w_rows * C * HW_pad * Bf_pad + Bf_pad * C * HW_pad     # matmul + max
    bytes_accessed = 2 * Bf_pad * C * HW_pad * itemsize + w_bytes

    out = pl.pallas_call(
        kernel,
        out_shape=jax.ShapeDtypeStruct((Bf_pad, C, HW_pad), x_flat.dtype),
        grid_spec=pltpu.PrefetchScalarGridSpec(
            num_scalar_prefetch=0,
            grid=(grid_b, grid_s),
            in_specs=[
                # Constant index_map: the weight block stays resident in VMEM and is
                # never re-fetched across grid steps (no per-step weight DMA).
                pl.BlockSpec((w_rows, C), lambda bi, si: (0, 0)),
                pl.BlockSpec((Bb, C, tile), lambda bi, si: (bi, 0, si)),
            ],
            out_specs=pl.BlockSpec((Bb, C, tile), lambda bi, si: (bi, 0, si)),
        ),
        compiler_params=pltpu.CompilerParams(
            # No reduction axis: both grid axes can be sharded across TensorCores
            # (helps v7x's 2 TCs; harmless on v5e/v6e).
            dimension_semantics=("parallel", "parallel"),
            vmem_limit_bytes=vmem_limit,
        ),
        cost_estimate=pl.CostEstimate(
            flops=int(flops), transcendentals=0,
            bytes_accessed=int(bytes_accessed)),
    )(w_arr, x_flat)

    if pad_b or pad_s:
        out = out[:Bf, :, :HW]
    return out


def equivariant_relu2(x, weight, groups):
    """x: (B, C, H, W) or (B, C); weight: (g, g, C//g) -- EquivariantConv2d.weight."""
    g = groups
    if x.ndim == 4:
        B, C, H, W = x.shape
    elif x.ndim == 2:
        B, C = x.shape
    else:
        raise ValueError(f"expected a 2-D or 4-D input, got ndim={x.ndim}")
    if C % g != 0:
        raise ValueError("groups must divide the number of features")
    per = C // g
    itemsize = jnp.dtype(x.dtype).itemsize

    # NOTE: for bf16/fp8 I/O the effective weight is quantized to the I/O dtype before
    # the MXU (accumulation stays f32); this differs from torch only by weight rounding.
    Wg = _effective_weight(weight, g, C).astype(x.dtype)               # (g, C)

    # Expanded-weight cutoff (HBM-roofline based): the (C, C) matmul stays hidden under
    # the x/out DMAs roughly while C <= ~512 for 4-byte I/O (v6e/v7x; slightly above the
    # v5e roofline but still mostly hidden) and ~1024 for 16-bit I/O.  The expanded path
    # keeps the max purely elementwise -- no reshape / broadcast relayout.
    expand_cutoff = 512 if itemsize >= 4 else 1024
    if C <= expand_cutoff:
        w_arr = Wg[jnp.repeat(jnp.arange(g), per), :]                  # (C, C)
        kernel = _kernel_expanded
    else:
        w_arr = Wg                                                     # (g, C)
        sublane_pack = 32 // itemsize                                  # rows per packed sublane tile
        if per % sublane_pack == 0 and g <= 32:
            kernel = _kernel_grouped_sliced     # aligned static row slices, no relayout
        else:
            kernel = _kernel_grouped_reshape    # reshape/broadcast fallback

    if x.ndim == 4:
        HW = H * W
        out = _run_kernel(x.reshape(B, C, HW), w_arr, kernel, HW)
        return out.reshape(B, C, H, W)
    else:
        # 2-D input (HW == 1 in the torch module): batch rides the lane axis so stores
        # stay lane-dense instead of padding a size-1 spatial dim to 128 lanes.
        x_flat = x.T[None]                                             # (1, C, B)
        out = _run_kernel(x_flat, w_arr, kernel, B)                    # (1, C, B)
        return out[0].T                                                # (B, C)


# ------------------------------------------------------------------ reference
def _reference(x, weight, groups):
    """Pure-JAX reference written directly from the PyTorch forward (independent of the
    helpers used by the kernel path)."""
    g = groups
    y = x if x.ndim == 4 else x[..., None, None]
    B, C, H, W = y.shape
    k = C                                                              # kernel_size = 1
    a = (g * jnp.arange(k)) // k                                       # torch.div floor
    b = jnp.arange(g)
    W0 = (a[None, :] == b[:, None]).astype(jnp.float32) * (g / k)      # (g, C)
    Wc = weight.astype(jnp.float32)
    Wc = Wc - Wc.mean(axis=2, keepdims=True)                           # (g, g, C//g)
    W_eff = Wc.reshape(g, C) + W0                                      # (g, C)
    yf = y.astype(jnp.float32)
    m = jnp.einsum('ji,bihw->bjhw', W_eff, yf)                         # (B, g, H, W)
    out = jnp.maximum(yf.reshape(B, g, C // g, H, W), m[:, :, None])
    return out.reshape(B, C, H, W).reshape(x.shape).astype(x.dtype)


if __name__ == "__main__":
    groups, features = 2, 4
    B, H, W = 2, 16, 16

    key = jax.random.PRNGKey(0)
    kx, kw, kx2 = jax.random.split(key, 3)

    x = jax.random.normal(kx, (B, features, H, W), dtype=jnp.float32)

    # Deterministic Xavier-uniform init for weight (g, g, features//g):
    # fan_in = fan_out = g * (features // g) = features.
    bound = (6.0 / (features + features)) ** 0.5
    weight = jax.random.uniform(
        kw, (groups, groups, features // groups),
        minval=-bound, maxval=bound, dtype=jnp.float32)

    out = jax.block_until_ready(equivariant_relu2(x, weight, groups))
    ref = _reference(x, weight, groups)
    assert out.shape == x.shape
    assert jnp.allclose(out, ref, atol=1e-5, rtol=1e-5), "4-D mismatch vs reference"

    # 2-D input path (the torch module unsqueezes to HW == 1).
    x2 = jax.random.normal(kx2, (8, features), dtype=jnp.float32)
    out2 = jax.block_until_ready(equivariant_relu2(x2, weight, groups))
    ref2 = _reference(x2, weight, groups)
    assert out2.shape == x2.shape
    assert jnp.allclose(out2, ref2, atol=1e-5, rtol=1e-5), "2-D mismatch vs reference"

    print("KERNEL_OK")
</pallas_src>

<mosaic_0001>
module attributes {stable_mosaic.version = 11 : i64} {
  func.func @_kernel_expanded(%arg0: i32, %arg1: i32, %arg2: memref<4x4xf32, #tpu.memory_space<vmem>>, %arg3: memref<1x4x256xf32, #tpu.memory_space<vmem>>, %arg4: memref<1x4x256xf32, #tpu.memory_space<vmem>>) attributes {dimension_semantics = [#tpu.dimension_semantics<parallel>, #tpu.dimension_semantics<parallel>], iteration_bounds = array<i64: 2, 1>, scalar_prefetch = 0 : i64, scratch_operands = 0 : i64, tpu.core_type = #tpu.core_type<tc>, window_params = [{pipeline_mode = #tpu.pipeline_mode<synchronous>, transform_indices = @transform_0, window_bounds = array<i64: 4, 4>}, {transform_indices = @transform_1, window_bounds = array<i64: 1, 4, 256>}, {transform_indices = @transform_2, window_bounds = array<i64: 1, 4, 256>}]} {
    %c0 = arith.constant 0 : index
    %c0_0 = arith.constant 0 : index
    %0 = vector.load %arg2[%c0, %c0_0] : memref<4x4xf32, #tpu.memory_space<vmem>>, vector<4x4xf32>
    %c0_1 = arith.constant 0 : index
    %c0_2 = arith.constant 0 : index
    %c0_3 = arith.constant 0 : index
    %1 = vector.load %arg3[%c0_1, %c0_2, %c0_3] : memref<1x4x256xf32, #tpu.memory_space<vmem>>, vector<1x4x256xf32>
    %2 = vector.shape_cast %1 : vector<1x4x256xf32> to vector<4x256xf32>
    %cst = arith.constant dense<0.000000e+00> : vector<4x256xf32>
    %3 = tpu.matmul %0, %2, %cst {dimension_numbers = #tpu.dot_dimension_numbers<[1], [0], [0], [1], [0, 0, 1, 1], [], []>} : vector<4x4xf32>, vector<4x256xf32>, vector<4x256xf32> -> vector<4x256xf32>
    %4 = arith.maximumf %2, %3 : vector<4x256xf32>
    %c0_4 = arith.constant 0 : index
    %c0_5 = arith.constant 0 : index
    %c0_6 = arith.constant 0 : index
    %5 = vector.load %arg4[%c0_4, %c0_5, %c0_6] : memref<1x4x256xf32, #tpu.memory_space<vmem>>, vector<1x4x256xf32>
    %6 = vector.shape_cast %5 : vector<1x4x256xf32> to vector<4x256xf32>
    %7 = vector.shape_cast %4 : vector<4x256xf32> to vector<1x4x256xf32>
    tpu.vector_store %arg4[%c0_4, %c0_5, %c0_6], %7 {strides = array<i32>} : memref<1x4x256xf32, #tpu.memory_space<vmem>>, vector<1x4x256xf32>,
    return
  }
  func.func @transform_0(%arg0: i32, %arg1: i32) -> (i32, i32) {
    %c0_i32 = arith.constant 0 : i32
    %c0_i32_0 = arith.constant 0 : i32
    %c0_i32_1 = arith.constant 0 : i32
    return %c0_i32, %c0_i32_0 : i32, i32
  }
  func.func @transform_1(%arg0: i32, %arg1: i32) -> (i32, i32, i32) {
    %c0_i32 = arith.constant 0 : i32
    %c0_i32_0 = arith.constant 0 : i32
    return %arg0, %c0_i32, %arg1 : i32, i32, i32
  }
  func.func @transform_2(%arg0: i32, %arg1: i32) -> (i32, i32, i32) {
    %c0_i32 = arith.constant 0 : i32
    %c0_i32_0 = arith.constant 0 : i32
    return %arg0, %c0_i32, %arg1 : i32, i32, i32
  }
}

</mosaic_0001>

<bundles_post_ra>
// kernel: tpu_custom_call.1
= control target key start
LH: loop header
LB: loop body
LE: loop exit
PB: predicated region body
PF: predicated region fallthrough
CT: control target
= control target key end

     0   :  { %7 = vsyncpa [#allocation3], 0  ;;  %s874_s0 = inlined_call_operand.hbm [shape: f32[4,4], index: 0, kind: input, shape index: {}]   ;;  %s875_s1 = inlined_call_operand.hbm [shape: f32[2,4,256], index: 1, kind: input, shape index: {}]   ;;  %s876_s2 = inlined_call_operand.hbm [shape: f32[2,4,256], index: 2, kind: output, shape index: {}]  }
   0x1   :  { %8 = vsyncpa [#allocation6], 0 }
   0x2   :  { %10 = vsyncpa [#allocation6 + $0x1], 0 }
   0x3   :  { %11 = vsyncpa [#allocation4], 0 }
   0x4   :  { %13 = vsyncpa [#allocation4 + $0x1], 0  ;;  %s658_s9 = smov 0   ;;  %s660_s10 = smov 0  }
   0x5   :  { %s662_s11 = smov 0   ;;  %s664_s12 = smov 0  }
   0x6   :  { %s666_s13 = smov 0   ;;  %s668_s14 = smov 0  }
   0x7 LB: > { %s396_s15 = sadd.s32 4294967295, %s637_s14   ;;  %s397_s16 = sadd.s32 4294967294, %s637_s14   ;;  %s637_s14 = sphi %s668_s14, %s19_s14   ;;  %s633_s13 = sphi %s666_s13, %s901_s13   ;;  %s629_s12 = sphi %s664_s12, %s900_s12   ;;  %s625_s11 = sphi %s662_s11, %s899_s11   ;;  %s621_s10 = sphi %s660_s10, %s898_s10   ;;  %s617_s9 = sphi %s658_s9, %s897_s9  }
   0x8   : > { %p74_p0 = scmp.ne.s32.totalorder %s621_s10, %s617_s9  ;;  %p692_p1 = scmp.eq.s32.totalorder %s396_s15, 0 }
   0x9   : > { %p696_p2 = scmp.eq.s32.totalorder %s396_s15, 1  ;;  %p106_p3 = scmp.eq.s32.totalorder %s397_s16, 1 }
   0xa   : > { %s881_s17 = scalar_select %p692_p1, 1, 0 }
   0xb   : > { %s882_s18 = scalar_select %p696_p2, 1, 0 }
   0xc   : > { %p702_p4 = por %p692_p1, %p74_p0  ;;  %p398_p5 = scmp.ge.s32.totalorder %s637_s14, 1 }
   0xd   : > { %p707_p6 = por %p106_p3, %p74_p0  ;;  %p113_p7 = scmp.lt.s32.totalorder %s637_s14, 3 }
   0xe   : > { %s883_s19 = scalar_select %p702_p4, 1, 0 }
   0xf   : > { %s884_s20 = scalar_select %p707_p6, 1, 0 }
  0x10   : > { %p712_p8 = pnand %p398_p5, %p113_p7  ;;  %s639_s22 = smov [#allocation2]  }
  0x11   : > { %s126_s23 = sshll.u32 %s639_s22, 4  ;;  %s31_s25 = sadd.s32 1, %s633_s13  ;;  %s127_s23 = int_to_ptr.vmem [resolvable:$true] %s126_s23 }
  0x12   : > { %s885_s21 = scalar_select %p712_p8, 1, 0 }
  0x13   : > { %p426_p10 = pneg %p712_p8  ;;  %s61_s26 = sadd.s32 1, %s625_s11 }
  0x14   : > { %p727_p12 = scmp.ge.s32.totalorder %s31_s25, 2  ;;  %s493_s30 = scalar_lea.hbm %s874_s0, 64 }
  0x15   : > { %p721_p11 = pnand %p426_p10, %p692_p1  ;;  %p494_p13 = scmp.ne.s32.totalorder %s874_s0, %s493_s30 }
  0x16   : > { %s887_s27 = scalar_select %p727_p12, 1, 0 }
  0x17   : > { %p495_p0 = pneg %p721_p11  ;;  %p500_p7 = scmp.lt.u32.totalorder %s493_s30, %s874_s0 }
  0x19   : > { %p496_p3 = pnand %p495_p0, %p494_p13 }
  0x1b   : > { %p497_p5 = pneg %p496_p3 }
  0x1d   : > { %p502_p10 = pnand %p500_p7, %p497_p5 }
  0x1f   : > { %505 = shalt.err (!%p502_p10)
}
  0x20   : > { %s506_s7 = scalar_lea.vmem %s127_s23, 64  ;;  %p514_p1 = scmp.lt.s32.totalorder %s127_s23, %s127_s23 }
  0x21   : > { %p507_p9 = scmp.ne.s32.totalorder %s127_s23, %s506_s7  ;;  %p515_p8 = scmp.lt.s32.totalorder %s506_s7, %s506_s7 }
  0x23   : > { %p509_p6 = pnand %p507_p9, %p495_p0  ;;  %p516_p2 = por %p515_p8, %p514_p1 }
  0x25   : > { %p510_p4 = pneg %p509_p6 }
  0x27   : > { %p517_p12 = pnand %p516_p2, %p510_p4 }
  0x29   : > { %520 = shalt.err (!%p517_p12)
}
  0x2a   : > { %429 = dma.hbm_to_vmem [thread:$0]  (!%p721_p11), %s874_s0, 64, %s127_s23, [#allocation3]  }
  0x2b   : > { %p888_p1 = scmp.ne.s32.totalorder %s887_s27, 0  ;;  %p68_p2 = scmp.ne.s32.totalorder %s625_s11, %s621_s10 }
  0x2c   : > { %p69_p4 = scmp.eq.s32.totalorder %s637_s14, 0  ;;  %p439_p6 = scmp.lt.s32.totalorder %s637_s14, 2 }
  0x2d   : > { %s903_s25 = smov (%p888_p1, %s31_s25), 0  ;;  %p889_p12 = scmp.ne.s32.totalorder %s882_s18, 0 }
  0x2e   : > { %s56_s16 = ssub.s32 %s633_s13, %s903_s25  ;;  %p70_p9 = por %p69_p4, %p68_p2 }
  0x2f   : > { %p59_p8 = scmp.eq.s32.totalorder %s56_s16, 0  ;;  %p759_p13 = por %p889_p12, %p68_p2 }
  0x30   : > { %s137_s24 = sand.u32 1, %s625_s11   ;;  %s416_s27 = sshll.u32 %s633_s13, 7 }
  0x31   : > { %s767_s28 = scalar_select %p59_p8, %s625_s11, %s61_s26  }
  0x32   : > { %s401_s23 = sshll.u32 %s137_s24, 3  ;;  %s773_s3 = scalar_lea.hbm %s875_s1, %s416_s27 }
  0x33   : > { %s141_s18 = scalar_lea.vmem [#allocation5], %s401_s23  ;;  %p777_p11 = pnand %p439_p6, %p70_p9 }
  0x34   : > { %s151_s4 = sshll.u32 %s141_s18, 4  ;;  %s138_s26 = scalar_lea.sflag [#allocation6], %s137_s24  ;;  %s775_s4 = int_to_ptr.vmem [resolvable:$true] %s151_s4 }
  0x35   : > { %s521_s6 = scalar_lea.hbm %s773_s3, 128  ;;  %p523_p3 = pneg %p777_p11 }
  0x36   : > { %p522_p0 = scmp.ne.s32.totalorder %s773_s3, %s521_s6  ;;  %s526_s15 = scalar_lea.hbm %s875_s1, 256 }
  0x37   : > { %p527_p10 = scmp.lt.u32.totalorder %s773_s3, %s875_s1  ;;  %p528_p1 = scmp.lt.u32.totalorder %s526_s15, %s521_s6 }
  0x38   : > { %p524_p5 = pnand %p523_p3, %p522_p0  ;;  %p530_p4 = scmp.lt.u32.totalorder %s521_s6, %s773_s3 }
  0x39   : > { %p529_p2 = por %p528_p1, %p527_p10 }
  0x3a   : > { %p525_p7 = pneg %p524_p5 }
  0x3b   : > { %p531_p6 = por %p530_p4, %p529_p2 }
  0x3d   : > { %p532_p8 = pnand %p531_p6, %p525_p7 }
  0x3f   : > { %535 = shalt.err (!%p532_p8)
}
  0x40   : > { %s536_s24 = scalar_lea.vmem %s775_s4, 128  ;;  %s640_s27 = smov [#allocation5]  }
  0x41   : > { %p537_p9 = scmp.ne.s32.totalorder %s775_s4, %s536_s24  ;;  %s541_s29 = sshll.u32 %s640_s27, 4  ;;  %s542_s29 = int_to_ptr.vmem [resolvable:$false] %s541_s29 }
  0x42   : > { %s543_s30 = scalar_lea.vmem %s542_s29, 256  ;;  %p544_p5 = scmp.lt.s32.totalorder %s775_s4, %s542_s29 }
  0x43   : > { %p539_p12 = pnand %p537_p9, %p523_p3  ;;  %p545_p10 = scmp.lt.s32.totalorder %s543_s30, %s536_s24 }
  0x45   : > { %p540_p0 = pneg %p539_p12  ;;  %p546_p1 = por %p545_p10, %p544_p5 }
  0x47   : > { %p547_p2 = pnand %p546_p1, %p540_p0 }
  0x49   : > { %550 = shalt.err (!%p547_p2)
}
  0x4a   : > { %433 = dma.hbm_to_vmem [thread:$0]  (!%p777_p11), %s773_s3, 128, %s775_s4, %s138_s26  }
  0x4b   : > { %p892_p7 = scmp.ne.s32.totalorder %s885_s21, 0 }
  0x4c   : > { %p893_p3 = scmp.ne.s32.totalorder (!%p892_p7), %s881_s17, 0 }
  0x4d   : > { %160 = sbr.rel (%p892_p7) target bundleno = 325 (0x145), region = 28 }
  0x54   : > { %604 = dma.done.wait (%p893_p3), [#allocation3], 64  }
  0x55   : > { %606 = vsyncadd (%p893_p3), [#allocation3], 4294967232  ;;  %s813_s18 = sand.u32 1, %s621_s10   ;;  %p894_p4 = scmp.ne.s32.totalorder %s883_s19, 0 }
  0x56   : > { %s406_s6 = sshll.u32 %s813_s18, 3  ;;  %s167_s5 = scalar_lea.sflag [#allocation6], %s813_s18 }
  0x57   : > { %s170_s7 = scalar_lea.vmem [#allocation5], %s406_s6 }
  0x58   : > { %608 = dma.done.wait (%p894_p4), %s167_s5, 128  }
  0x59   : > { %610 = vsyncadd (%p894_p4), %s167_s5, 4294967168  ;;  %v641_v0 = vmov 0.0   ;;  %v194_v1 = vld [vmem:[%s170_s7] sm:$0xff]  ;;  %vm201_vm0 = vcmask 1043456   ;;  %v193_v3 = vld [vmem:[#allocation2] sm:$0xf] }
  0x5a   : > { %270 = vmatprep.mubr.f32.mxu0 %v641_v0  ;;  %v196_v2 = vcombine.high %v194_v1, %v194_v1  ;;  %vm197_vm1 = vcmask 31744   ;;  %s417_s17 = sshll.u32 %s629_s12, 7  ;;  %s190_s21 = scalar_lea.vmem [#allocation7], %s406_s6 }
  0x5b   : > { %s300_s3 = sshll.u32 %s190_s21, 4  ;;  %s825_s26 = scalar_lea.hbm %s876_s2, %s417_s17  ;;  %s827_s3 = int_to_ptr.vmem [resolvable:$true] %s300_s3 }
  0x5c   : > { %408 = vmatprep.subr.msk.mxu0 %vm201_vm0, %v196_v2  ;;  %s284_s8 = scalar_lea.sflag [#allocation4], %s813_s18  ;;  %s551_s15 = scalar_lea.vmem %s827_s3, 128 }
  0x5d   : > { %409 = vmatpush1.msk.msra.mxu0 %vm201_vm0, %v194_v1  ;;  %p552_p11 = scmp.ne.s32.totalorder %s827_s3, %s551_s15  ;;  %s642_s12 = smov [#allocation7]  }
  0x5e   : > { %410 = vmatmul.mubr.msk.f32.vlgmr.msra.gmra.mrb[0].mxu0 %vm197_vm1, %v193_v3  ;;  %s555_s16 = sshll.u32 %s642_s12, 4  ;;  %s556_s16 = int_to_ptr.vmem [resolvable:$false] %s555_s16 }
  0x5f   : > { %p553_p6 = pnand %p552_p11, %p759_p13  ;;  %s557_s23 = scalar_lea.vmem %s556_s16, 256 }
  0x60   : > { %p558_p9 = scmp.lt.s32.totalorder %s827_s3, %s556_s16  ;;  %p559_p12 = scmp.lt.s32.totalorder %s557_s23, %s551_s15 }
  0x61   : > { %p554_p8 = pneg %p553_p6 }
  0x62   : > { %p560_p0 = por %p559_p12, %p558_p9 }
  0x64   : > { %p561_p5 = pnand %p560_p0, %p554_p8 }
 0x131   : > { %v272_v4 = vpop.f32.mrb[0].mxu0 }
 0x132   : > { %v274_v5 = vpop.f32.mrb[1].mxu0 }
 0x133   : > { %v279_v6 = vcombine.low %v272_v4, %v274_v5 }
 0x135   : > { %v281_v7 = vmax.f32 %v194_v1, %v279_v6 }
 0x137   : > { %282 = vst [vmem:[%s190_s21] sm:$0xff] %v281_v7 }
 0x138   : > { %564 = shalt.err (!%p561_p5)
}
 0x139   : > { %s565_s24 = scalar_lea.hbm %s825_s26, 128  ;;  %s569_s30 = scalar_lea.hbm %s876_s2, 256 }
 0x13a   : > { %p566_p10 = scmp.ne.s32.totalorder %s825_s26, %s565_s24  ;;  %p570_p7 = scmp.lt.u32.totalorder %s825_s26, %s876_s2 }
 0x13b   : > { %p571_p3 = scmp.lt.u32.totalorder %s569_s30, %s565_s24  ;;  %p573_p11 = scmp.lt.u32.totalorder %s565_s24, %s825_s26 }
 0x13c   : > { %p567_p1 = pnand %p566_p10, %p759_p13 }
 0x13d   : > { %p572_p4 = por %p571_p3, %p570_p7 }
 0x13e   : > { %p568_p2 = pneg %p567_p1 }
 0x13f   : > { %p574_p6 = por %p573_p11, %p572_p4 }
 0x141   : > { %p575_p8 = pnand %p574_p6, %p568_p2 }
 0x143   : > { %578 = shalt.err (!%p575_p8)
}
 0x144   : > { %424 = dma.vmem_to_hbm [thread:$0]  (%p759_p13), %s827_s3, 128, %s825_s26, %s284_s8  }
 0x145 PF: > { %s312_s5 = sand.u32 1, %s617_s9   ;;  %p895_p9 = scmp.ne.s32.totalorder %s884_s20, 0 }
 0x146   : > { %p896_p12 = scmp.ge.s32.totalorder %s637_s14, 2  ;;  %s313_s7 = scalar_lea.sflag [#allocation4], %s312_s5 }
 0x148   : > { %p435_p0 = pnand %p896_p12, %p895_p9 }
 0x14a   : > { %612 = dma.done.wait (!%p435_p0), %s313_s7, 128  }
 0x14b   : > { %614 = vsyncadd (!%p435_p0), %s313_s7, 4294967168  ;;  %s19_s14 = sadd.s32 1, %s637_s14   ;;  %s897_s9 = smov %s621_s10 }
 0x14c   : > { %p16_p5 = scmp.ge.s32.totalorder %s19_s14, 4   ;;  %s898_s10 = smov %s625_s11 }
 0x14d   : > { %s899_s11 = smov %s767_s28  ;;  %s900_s12 = smov %s633_s13 }
 0x14e   : > { %s901_s13 = smov %s903_s25  ;;  %18 = sbr.rel (!%p16_p5) target bundleno = 7 (0x7), region = 78 }
 0x155   :  { %318 = vsyncpa [#allocation3], 1 }
 0x156   :  { %320 = vsyncpa [#allocation3 + $0x1], 1 }
 0x157   :  { %321 = vsyncpa [#allocation6], 1 }
 0x158   :  { %323 = vsyncpa [#allocation6 + $0x1], 1 }
 0x159   :  { %324 = vsyncpa [#allocation4], 1 }
 0x15a   :  { %326 = vsyncpa [#allocation4 + $0x1], 1 }

</bundles_post_ra>
